<compile_context>
chip_gen: v5e
topology: v5e:2x2
jax: 0.10.0
libtpu: 0.0.40
codegen_flags: <defaults>
</compile_context>

<pallas_src>
import functools
import math

import jax
import jax.numpy as jnp
from jax.experimental import pallas as pl
from jax.experimental.pallas import tpu as pltpu


def _embed_kernel(ids_ref, tbl_ref, o_ref, *, packs, vchunk, scale):
    """Gather one block of token embeddings via a chunked one-hot matmul.

    ids_ref: (br, packs) int32 token ids, pre-offset so the p-th packed token
             selects rows [p*V, (p+1)*V) of the packed table.
    tbl_ref: (packs*V, packs*D) packed (block-diagonal) embedding table.
    o_ref:   (br, packs*D) output block (lane-dense when packs*D == 128).
    """
    ids = ids_ref[...]                                  # (br, packs) int32
    br = ids.shape[0]
    pv, w = tbl_ref.shape

    acc = jnp.zeros((br, w), dtype=jnp.float32)
    # Chunk the vocab axis so the (br, chunk) one-hot intermediate is bounded
    # regardless of block size / vocab size (static Python loop, unrolled).
    for c0 in range(0, pv, vchunk):
        c = min(vchunk, pv - c0)
        col = jax.lax.broadcasted_iota(jnp.int32, (br, c), 1) + c0
        hit = col == ids[:, 0:1]
        for p in range(1, packs):
            hit = jnp.logical_or(hit, col == ids[:, p:p + 1])
        onehot = hit.astype(tbl_ref.dtype)              # 0/1 exact in any dtype
        acc = acc + jnp.dot(onehot, tbl_ref[c0:c0 + c, :],
                            preferred_element_type=jnp.float32)
    if scale is not None:
        acc = acc * scale
    o_ref[...] = acc.astype(o_ref.dtype)


def embeddings_forward(ids, table, scale_factor=None, *,
                       max_block_tokens=512, vocab_chunk=2048):
    """Pallas Embeddings forward.

    ids:    [B, T] int32 token indices
    table:  [V, D] embedding table (padding_idx row is simply a zero row,
            lookup semantics unchanged)
    scale_factor: optional python float (Transformer sqrt(D) scaling)
    returns [B, T, D]
    """
    B, T = ids.shape
    V, D = table.shape
    n_tok = B * T
    itemsize = jnp.dtype(table.dtype).itemsize

    # ---- lane-dense packing factor: P tokens per 128-lane output row -------
    if D % 128 == 0:
        packs = 1                         # already lane-dense
    elif 128 % D == 0:
        packs = 128 // D                  # e.g. D=64 -> pack 2 tokens per row
    else:
        packs = 1                         # awkward D: fall back (masked stores)
    W = packs * D
    min_tb = 8 * packs                    # >= 8 sublanes of packed rows

    # ---- choose tokens-per-block; avoid the post-kernel slice if possible --
    n_min = -(-n_tok // min_tb) * min_tb
    tb = max(min_tb, (min(max_block_tokens, n_min) // min_tb) * min_tb)
    n_pad = n_min if n_min % tb == 0 else -(-n_tok // tb) * tb

    # ---- flatten / pad / pack the token ids --------------------------------
    ids_flat = ids.reshape(n_tok).astype(jnp.int32)
    if n_pad != n_tok:
        ids_flat = jnp.concatenate(
            [ids_flat, jnp.zeros((n_pad - n_tok,), jnp.int32)])
    rows = n_pad // packs
    br = tb // packs
    ids_pk = ids_flat.reshape(rows, packs)
    if packs > 1:
        ids_pk = ids_pk + (jnp.arange(packs, dtype=jnp.int32) * V)[None, :]

    # ---- block-diagonal packed table (precompute once in a real model) -----
    if packs > 1:
        tbl_pk = jnp.zeros((packs * V, W), table.dtype)
        for p in range(packs):
            tbl_pk = tbl_pk.at[p * V:(p + 1) * V, p * D:(p + 1) * D].set(table)
    else:
        tbl_pk = table

    grid = (rows // br,)

    # ---- VMEM budget (table single-buffered via Buffered(1)) ---------------
    vchunk_eff = min(vocab_chunk, packs * V)
    tbl_bytes = packs * V * W * itemsize
    vmem_needed = (tbl_bytes
                   + 2 * br * packs * 4          # ids blocks (double-buffered)
                   + 2 * br * W * itemsize       # output blocks
                   + 2 * br * vchunk_eff * 4     # one-hot intermediate headroom
                   + (4 << 20))
    vmem_limit = int(min(64 << 20, max(vmem_needed, 16 << 20)))

    cost = pl.CostEstimate(
        flops=2 * rows * (packs * V) * W,
        transcendentals=0,
        bytes_accessed=int(ids_pk.size * 4 + tbl_pk.size * itemsize
                           + rows * W * itemsize),
    )

    out = pl.pallas_call(
        functools.partial(_embed_kernel, packs=packs, vchunk=vocab_chunk,
                          scale=scale_factor),
        out_shape=jax.ShapeDtypeStruct((rows, W), table.dtype),
        grid_spec=pltpu.PrefetchScalarGridSpec(
            num_scalar_prefetch=0,
            grid=grid,
            in_specs=[
                # token-id tile, pipelined per grid step
                pl.BlockSpec((br, packs), lambda i: (i, 0)),
                # packed table: constant index map, fetched once,
                # single-buffered (dead second buffer removed)
                pl.BlockSpec((packs * V, W), lambda i: (0, 0),
                             pipeline_mode=pl.Buffered(1)),
            ],
            out_specs=pl.BlockSpec((br, W), lambda i: (i, 0)),
        ),
        compiler_params=pltpu.CompilerParams(
            dimension_semantics=("parallel",),
            vmem_limit_bytes=vmem_limit),
        cost_estimate=cost,
    )(ids_pk, tbl_pk)

    # (rows, W) row-major is bit-identical to (n_pad, D) row-major.
    out = out.reshape(n_pad, D)
    if n_pad != n_tok:
        out = out[:n_tok]
    return out.reshape(B, T, D)


if __name__ == "__main__":
    key = jax.random.PRNGKey(0)
    k_tbl, k_ids, k_tbl2, k_ids2, k_ids3 = jax.random.split(key, 5)

    # Case 1: module defaults (embedding_dim=64, padding_idx=1), vocab=512.
    B, T, V, D = 2, 8, 512, 64
    padding_idx = 1
    table = jax.random.normal(k_tbl, (V, D), dtype=jnp.float32)
    table = table.at[padding_idx].set(0.0)              # nn.Embedding padding row
    ids = jax.random.randint(k_ids, (B, T), 0, V, dtype=jnp.int32)
    ids = ids.at[0, -1].set(padding_idx)                # include a padding token

    out_plain = jax.block_until_ready(embeddings_forward(ids, table))
    ref_plain = table[ids]
    assert out_plain.shape == (B, T, D)
    assert jnp.allclose(out_plain, ref_plain, atol=1e-5, rtol=1e-5), \
        "mismatch vs reference (no scale)"

    # scale=True: x * sqrt(embedding_dim) (Transformer usage).
    sf = math.sqrt(D)
    out_scaled = jax.block_until_ready(
        embeddings_forward(ids, table, scale_factor=sf))
    assert jnp.allclose(out_scaled, ref_plain * sf, atol=1e-4, rtol=1e-4), \
        "mismatch vs reference (scaled)"

    # Case 2: ragged token count (exercises pad + slice tail handling).
    ids_r = jax.random.randint(k_ids2, (3, 5), 0, V, dtype=jnp.int32)
    out_r = jax.block_until_ready(embeddings_forward(ids_r, table))
    assert jnp.allclose(out_r, table[ids_r], atol=1e-5, rtol=1e-5), \
        "mismatch vs reference (ragged)"

    # Case 3: D multiple of 128 (no packing path).
    V3, D3 = 256, 128
    table3 = jax.random.normal(k_tbl2, (V3, D3), dtype=jnp.float32)
    ids3 = jax.random.randint(k_ids3, (2, 8), 0, V3, dtype=jnp.int32)
    out3 = jax.block_until_ready(embeddings_forward(ids3, table3))
    assert jnp.allclose(out3, table3[ids3], atol=1e-5, rtol=1e-5), \
        "mismatch vs reference (D=128)"

    print("KERNEL_OK")
</pallas_src>

<mosaic_0001>
module attributes {stable_mosaic.version = 11 : i64} {
  func.func @_embed_kernel(%arg0: i32, %arg1: memref<8x2xi32, #tpu.memory_space<vmem>>, %arg2: memref<1024x128xf32, #tpu.memory_space<vmem>>, %arg3: memref<8x128xf32, #tpu.memory_space<vmem>>) attributes {dimension_semantics = [#tpu.dimension_semantics<parallel>], iteration_bounds = array<i64: 1>, scalar_prefetch = 0 : i64, scratch_operands = 0 : i64, tpu.core_type = #tpu.core_type<tc>, window_params = [{transform_indices = @transform_0, window_bounds = array<i64: 8, 2>}, {pipeline_mode = #tpu.pipeline_mode<synchronous>, transform_indices = @transform_1, window_bounds = array<i64: 1024, 128>}, {transform_indices = @transform_2, window_bounds = array<i64: 8, 128>}]} {
    %c0 = arith.constant 0 : index
    %c0_0 = arith.constant 0 : index
    %0 = vector.load %arg1[%c0, %c0_0] : memref<8x2xi32, #tpu.memory_space<vmem>>, vector<8x2xi32>
    %cst = arith.constant 0.000000e+00 : f32
    %1 = vector.broadcast %cst : f32 to vector<8x128xf32>
    %2 = tpu.iota {dimensions = array<i32: 1>} : vector<8x1024xi32>
    %c0_i32 = arith.constant 0 : i32
    %3 = vector.broadcast %c0_i32 : i32 to vector<8x1024xi32>
    %4 = arith.addi %2, %3 : vector<8x1024xi32>
    %5 = vector.extract_strided_slice %0 {offsets = [0, 0], sizes = [8, 1], strides = [1, 1]} : vector<8x2xi32> to vector<8x1xi32>
    %6 = vector.broadcast %5 : vector<8x1xi32> to vector<8x1024xi32>
    %7 = arith.cmpi eq, %4, %6 : vector<8x1024xi32>
    %8 = vector.extract_strided_slice %0 {offsets = [0, 1], sizes = [8, 1], strides = [1, 1]} : vector<8x2xi32> to vector<8x1xi32>
    %9 = vector.broadcast %8 : vector<8x1xi32> to vector<8x1024xi32>
    %10 = arith.cmpi eq, %4, %9 : vector<8x1024xi32>
    %11 = arith.ori %7, %10 : vector<8x1024xi1>
    %12 = arith.extui %11 : vector<8x1024xi1> to vector<8x1024xi32>
    %13 = arith.sitofp %12 : vector<8x1024xi32> to vector<8x1024xf32>
    %c0_1 = arith.constant 0 : index
    %c0_2 = arith.constant 0 : index
    %14 = vector.load %arg2[%c0_1, %c0_2] : memref<1024x128xf32, #tpu.memory_space<vmem>>, vector<1024x128xf32>
    %cst_3 = arith.constant dense<0.000000e+00> : vector<8x128xf32>
    %15 = tpu.matmul %13, %14, %cst_3 {dimension_numbers = #tpu.dot_dimension_numbers<[1], [0], [0], [1], [0, 0, 1, 1], [], []>} : vector<8x1024xf32>, vector<1024x128xf32>, vector<8x128xf32> -> vector<8x128xf32>
    %16 = arith.addf %1, %15 : vector<8x128xf32>
    %c0_4 = arith.constant 0 : index
    %c0_5 = arith.constant 0 : index
    %17 = vector.load %arg3[%c0_4, %c0_5] : memref<8x128xf32, #tpu.memory_space<vmem>>, vector<8x128xf32>
    tpu.vector_store %arg3[%c0_4, %c0_5], %16 {strides = array<i32>} : memref<8x128xf32, #tpu.memory_space<vmem>>, vector<8x128xf32>,
    return
  }
  func.func @transform_0(%arg0: i32) -> (i32, i32) {
    %c0_i32 = arith.constant 0 : i32
    %c0_i32_0 = arith.constant 0 : i32
    return %arg0, %c0_i32 : i32, i32
  }
  func.func @transform_1(%arg0: i32) -> (i32, i32) {
    %c0_i32 = arith.constant 0 : i32
    %c0_i32_0 = arith.constant 0 : i32
    %c0_i32_1 = arith.constant 0 : i32
    return %c0_i32, %c0_i32_0 : i32, i32
  }
  func.func @transform_2(%arg0: i32) -> (i32, i32) {
    %c0_i32 = arith.constant 0 : i32
    %c0_i32_0 = arith.constant 0 : i32
    return %arg0, %c0_i32 : i32, i32
  }
}

</mosaic_0001>

<bundles_post_ra>
// kernel: tpu_custom_call.1
= control target key start
LH: loop header
LB: loop body
LE: loop exit
PB: predicated region body
PF: predicated region fallthrough
CT: control target
= control target key end

     0   :  { %7 = vsyncpa [#allocation3], 0  ;;  %s498_s0 = inlined_call_operand.vmem [shape: s32[8,2], index: 0, kind: input, shape index: {}]   ;;  %s499_s1 = inlined_call_operand.hbm [shape: f32[1024,128], index: 1, kind: input, shape index: {}]   ;;  %s500_s2 = inlined_call_operand.hbm [shape: f32[8,128], index: 2, kind: output, shape index: {}]  }
   0x1   :  { %8 = vsyncpa [#allocation4], 0  ;;  %s15_s11 = sshll.u32 %s499_s1, 4  ;;  %s467_s12 = smov [#allocation2]   ;;  %s16_s11 = int_to_ptr.hbm [resolvable:$true] %s15_s11 }
   0x2   :  { %s17_s13 = sshll.u32 %s467_s12, 4  ;;  %s468_s14 = smov 128   ;;  %s18_s13 = int_to_ptr.vmem [resolvable:$true] %s17_s13 }
   0x3   :  { %s469_s15 = smov 8  }
   0x4   :  { %23 = dma.hbm_to_vmem [thread:$0]  %s16_s11, 16384, %s18_s13, [#allocation3], %s468_s14, %s468_s14, %s469_s15  }
   0x5   :  { %463 = dma.done.wait [#allocation3], 16384  }
   0x6   :  { %464 = vsyncadd [#allocation3], 4294950912  ;;  %v470_v0 = vmov 0   ;;  %v28_v1 = vld [vmem:[%s498_s0] sm:$0xff]  ;;  %v99_v2 = vld [vmem:[#allocation2 + $0x78] sm:$0xff]  ;;  %v471_v21 = vmov 1  }
   0x7   :  { %413 = vset.pattern.permute.xlu0 %v470_v0  ;;  %v115_v3 = vld [vmem:[#allocation2 + $0xf8] sm:$0xff]  ;;  %212 = vmatpush.msra.mxu0 %v99_v2  ;;  %v98_v6 = vld [vmem:[#allocation2 + $0x70] sm:$0xff]  ;;  %v97_v10 = vld [vmem:[#allocation2 + $0x68] sm:$0xff]  ;;  %s473_s0 = smov [#allocation5]   ;;  %s380_s20 = sshll.u32 %s500_s2, 4  ;;  %s381_s20 = int_to_ptr.hbm [resolvable:$true] %s380_s20 }
   0x8   :  { %39 = vperm.xlu0 %413, %v28_v1   ;;  %v131_v4 = vld [vmem:[#allocation2 + $0x178] sm:$0xff]  ;;  %232 = vmatpush.msra.mxu1 %v115_v3  ;;  %v114_v7 = vld [vmem:[#allocation2 + $0xf0] sm:$0xff]  ;;  %v113_v11 = vld [vmem:[#allocation2 + $0xe8] sm:$0xff]  ;;  %s378_s1 = sshll.u32 %s473_s0, 4  ;;  %s379_s1 = int_to_ptr.vmem [resolvable:$true] %s378_s1 }
   0x9   :  { %v147_v5 = vld [vmem:[#allocation2 + $0x1f8] sm:$0xff]  ;;  %252 = vmatpush.msra.mxu2 %v131_v4  ;;  %v130_v8 = vld [vmem:[#allocation2 + $0x170] sm:$0xff]  ;;  %213 = vmatpush.msra.mxu0 %v98_v6  ;;  %v129_v12 = vld [vmem:[#allocation2 + $0x168] sm:$0xff] }
   0xa   :  { %v146_v9 = vld [vmem:[#allocation2 + $0x1f0] sm:$0xff]  ;;  %272 = vmatpush.msra.mxu3 %v147_v5  ;;  %233 = vmatpush.msra.mxu1 %v114_v7  ;;  %v145_v13 = vld [vmem:[#allocation2 + $0x1e8] sm:$0xff]  ;;  %v96_v14 = vld [vmem:[#allocation2 + $0x60] sm:$0xff] }
   0xb   :  { %253 = vmatpush.msra.mxu2 %v130_v8  ;;  %214 = vmatpush.msra.mxu0 %v97_v10  ;;  %v112_v15 = vld [vmem:[#allocation2 + $0xe0] sm:$0xff]  ;;  %v95_v18 = vld [vmem:[#allocation2 + $0x58] sm:$0xff]  ;;  %v94_v23 = vld [vmem:[#allocation2 + $0x50] sm:$0xff] }
   0xc   :  { %273 = vmatpush.msra.mxu3 %v146_v9  ;;  %v128_v16 = vld [vmem:[#allocation2 + $0x160] sm:$0xff]  ;;  %234 = vmatpush.msra.mxu1 %v113_v11  ;;  %v111_v19 = vld [vmem:[#allocation2 + $0xd8] sm:$0xff]  ;;  %v110_v24 = vld [vmem:[#allocation2 + $0xd0] sm:$0xff] }
   0xd   :  { %254 = vmatpush.msra.mxu2 %v129_v12  ;;  %v144_v17 = vld [vmem:[#allocation2 + $0x1e0] sm:$0xff]  ;;  %215 = vmatpush.msra.mxu0 %v96_v14  ;;  %v127_v20 = vld [vmem:[#allocation2 + $0x158] sm:$0xff]  ;;  %v126_v25 = vld [vmem:[#allocation2 + $0x150] sm:$0xff] }
   0xe   :  { %274 = vmatpush.msra.mxu3 %v145_v13  ;;  %235 = vmatpush.msra.mxu1 %v112_v15  ;;  %v143_v22 = vld [vmem:[#allocation2 + $0x1d8] sm:$0xff]  ;;  %v142_v26 = vld [vmem:[#allocation2 + $0x1d0] sm:$0xff]  ;;  %v93_v27 = vld [vmem:[#allocation2 + $0x48] sm:$0xff] }
   0xf   :  { %255 = vmatpush.msra.mxu2 %v128_v16  ;;  %216 = vmatpush.msra.mxu0 %v95_v18  ;;  %v109_v28 = vld [vmem:[#allocation2 + $0xc8] sm:$0xff]  ;;  %v92_v31 = vld [vmem:[#allocation2 + $0x40] sm:$0xff]  ;;  %v91_v35 = vld [vmem:[#allocation2 + $0x38] sm:$0xff] }
  0x10   :  { %414 = vset.pattern.permute.xlu0 %v471_v21  ;;  %275 = vmatpush.msra.mxu3 %v144_v17  ;;  %v125_v29 = vld [vmem:[#allocation2 + $0x148] sm:$0xff]  ;;  %v108_v32 = vld [vmem:[#allocation2 + $0xc0] sm:$0xff]  ;;  %v107_v36 = vld [vmem:[#allocation2 + $0xb8] sm:$0xff] }
  0x11   :  { %50 = vperm.xlu0 %414, %v28_v1   ;;  %236 = vmatpush.msra.mxu1 %v111_v19  ;;  %v141_v30 = vld [vmem:[#allocation2 + $0x1c8] sm:$0xff]  ;;  %v124_v33 = vld [vmem:[#allocation2 + $0x140] sm:$0xff]  ;;  %v123_v37 = vld [vmem:[#allocation2 + $0x138] sm:$0xff] }
  0x12   :  { %256 = vmatpush.msra.mxu2 %v127_v20  ;;  %276 = vmatpush.msra.mxu3 %v143_v22  ;;  %v140_v34 = vld [vmem:[#allocation2 + $0x1c0] sm:$0xff]  ;;  %v139_v38 = vld [vmem:[#allocation2 + $0x1b8] sm:$0xff]  ;;  %v90_v39 = vld [vmem:[#allocation2 + $0x30] sm:$0xff] }
  0x13   :  { %217 = vmatpush.msra.mxu0 %v94_v23  ;;  %237 = vmatpush.msra.mxu1 %v110_v24  ;;  %v106_v40 = vld [vmem:[#allocation2 + $0xb0] sm:$0xff]  ;;  %v89_v43 = vld [vmem:[#allocation2 + $0x28] sm:$0xff]  ;;  %v88_v47 = vld [vmem:[#allocation2 + $0x20] sm:$0xff] }
  0x14   :  { %257 = vmatpush.msra.mxu2 %v126_v25  ;;  %277 = vmatpush.msra.mxu3 %v142_v26  ;;  %v122_v41 = vld [vmem:[#allocation2 + $0x130] sm:$0xff]  ;;  %v105_v44 = vld [vmem:[#allocation2 + $0xa8] sm:$0xff]  ;;  %v104_v48 = vld [vmem:[#allocation2 + $0xa0] sm:$0xff] }
  0x15   :  { %218 = vmatpush.msra.mxu0 %v93_v27  ;;  %238 = vmatpush.msra.mxu1 %v109_v28  ;;  %v138_v42 = vld [vmem:[#allocation2 + $0x1b0] sm:$0xff]  ;;  %v121_v45 = vld [vmem:[#allocation2 + $0x128] sm:$0xff]  ;;  %v120_v49 = vld [vmem:[#allocation2 + $0x120] sm:$0xff] }
  0x16   :  { %258 = vmatpush.msra.mxu2 %v125_v29  ;;  %278 = vmatpush.msra.mxu3 %v141_v30  ;;  %v137_v46 = vld [vmem:[#allocation2 + $0x1a8] sm:$0xff]  ;;  %v136_v50 = vld [vmem:[#allocation2 + $0x1a0] sm:$0xff]  ;;  %v87_v51 = vld [vmem:[#allocation2 + $0x18] sm:$0xff] }
  0x17   :  { %219 = vmatpush.msra.mxu0 %v92_v31  ;;  %239 = vmatpush.msra.mxu1 %v108_v32  ;;  %v103_v52 = vld [vmem:[#allocation2 + $0x98] sm:$0xff]  ;;  %v86_v55 = vld [vmem:[#allocation2 + $0x10] sm:$0xff]  ;;  %v85_v59 = vld [vmem:[#allocation2 + $0x8] sm:$0xff] }
  0x18   :  { %259 = vmatpush.msra.mxu2 %v124_v33  ;;  %279 = vmatpush.msra.mxu3 %v140_v34  ;;  %v119_v53 = vld [vmem:[#allocation2 + $0x118] sm:$0xff]  ;;  %v102_v56 = vld [vmem:[#allocation2 + $0x90] sm:$0xff]  ;;  %v101_v60 = vld [vmem:[#allocation2 + $0x88] sm:$0xff] }
  0x19   :  { %220 = vmatpush.msra.mxu0 %v91_v35  ;;  %240 = vmatpush.msra.mxu1 %v107_v36  ;;  %v135_v54 = vld [vmem:[#allocation2 + $0x198] sm:$0xff]  ;;  %v118_v57 = vld [vmem:[#allocation2 + $0x110] sm:$0xff]  ;;  %v117_v61 = vld [vmem:[#allocation2 + $0x108] sm:$0xff] }
  0x1a   :  { %260 = vmatpush.msra.mxu2 %v123_v37  ;;  %280 = vmatpush.msra.mxu3 %v139_v38  ;;  %v134_v58 = vld [vmem:[#allocation2 + $0x190] sm:$0xff]  ;;  %v133_v62 = vld [vmem:[#allocation2 + $0x188] sm:$0xff]  ;;  %v84_v63 = vld [vmem:[#allocation2] sm:$0xff] }
  0x1b   :  { %221 = vmatpush.msra.mxu0 %v90_v39  ;;  %241 = vmatpush.msra.mxu1 %v106_v40  ;;  %v100_v0 = vld [vmem:[#allocation2 + $0x80] sm:$0xff]  ;;  %v163_v3 = vld [vmem:[#allocation2 + $0x278] sm:$0xff]  ;;  %v162_v7 = vld [vmem:[#allocation2 + $0x270] sm:$0xff] }
  0x1c   :  { %261 = vmatpush.msra.mxu2 %v122_v41  ;;  %281 = vmatpush.msra.mxu3 %v138_v42  ;;  %v116_v1 = vld [vmem:[#allocation2 + $0x100] sm:$0xff]  ;;  %v179_v4 = vld [vmem:[#allocation2 + $0x2f8] sm:$0xff]  ;;  %v178_v8 = vld [vmem:[#allocation2 + $0x2f0] sm:$0xff] }
  0x1d   :  { %222 = vmatpush.msra.mxu0 %v89_v43  ;;  %242 = vmatpush.msra.mxu1 %v105_v44  ;;  %v132_v2 = vld [vmem:[#allocation2 + $0x180] sm:$0xff]  ;;  %v195_v5 = vld [vmem:[#allocation2 + $0x378] sm:$0xff]  ;;  %v194_v9 = vld [vmem:[#allocation2 + $0x370] sm:$0xff] }
  0x1e   :  { %262 = vmatpush.msra.mxu2 %v121_v45  ;;  %282 = vmatpush.msra.mxu3 %v137_v46  ;;  %v211_v6 = vld [vmem:[#allocation2 + $0x3f8] sm:$0xff]  ;;  %v210_v10 = vld [vmem:[#allocation2 + $0x3f0] sm:$0xff]  ;;  %v161_v11 = vld [vmem:[#allocation2 + $0x268] sm:$0xff] }
  0x1f   :  { %223 = vmatpush.msra.mxu0 %v88_v47  ;;  %243 = vmatpush.msra.mxu1 %v104_v48  ;;  %v177_v12 = vld [vmem:[#allocation2 + $0x2e8] sm:$0xff]  ;;  %v160_v15 = vld [vmem:[#allocation2 + $0x260] sm:$0xff]  ;;  %v159_v19 = vld [vmem:[#allocation2 + $0x258] sm:$0xff] }
  0x20   :  { %263 = vmatpush.msra.mxu2 %v120_v49  ;;  %283 = vmatpush.msra.mxu3 %v136_v50  ;;  %v193_v13 = vld [vmem:[#allocation2 + $0x368] sm:$0xff]  ;;  %v176_v16 = vld [vmem:[#allocation2 + $0x2e0] sm:$0xff]  ;;  %v175_v20 = vld [vmem:[#allocation2 + $0x2d8] sm:$0xff] }
  0x21   :  { %224 = vmatpush.msra.mxu0 %v87_v51  ;;  %244 = vmatpush.msra.mxu1 %v103_v52  ;;  %v209_v14 = vld [vmem:[#allocation2 + $0x3e8] sm:$0xff]  ;;  %v192_v17 = vld [vmem:[#allocation2 + $0x360] sm:$0xff]  ;;  %v191_v21 = vld [vmem:[#allocation2 + $0x358] sm:$0xff] }
  0x22   :  { %264 = vmatpush.msra.mxu2 %v119_v53  ;;  %284 = vmatpush.msra.mxu3 %v135_v54  ;;  %v208_v18 = vld [vmem:[#allocation2 + $0x3e0] sm:$0xff]  ;;  %v207_v22 = vld [vmem:[#allocation2 + $0x3d8] sm:$0xff]  ;;  %v158_v23 = vld [vmem:[#allocation2 + $0x250] sm:$0xff] }
  0x23   :  { %225 = vmatpush.msra.mxu0 %v86_v55  ;;  %245 = vmatpush.msra.mxu1 %v102_v56  ;;  %v174_v24 = vld [vmem:[#allocation2 + $0x2d0] sm:$0xff]  ;;  %v157_v27 = vld [vmem:[#allocation2 + $0x248] sm:$0xff]  ;;  %v156_v31 = vld [vmem:[#allocation2 + $0x240] sm:$0xff] }
  0x24   :  { %265 = vmatpush.msra.mxu2 %v118_v57  ;;  %285 = vmatpush.msra.mxu3 %v134_v58  ;;  %v190_v25 = vld [vmem:[#allocation2 + $0x350] sm:$0xff]  ;;  %v173_v28 = vld [vmem:[#allocation2 + $0x2c8] sm:$0xff]  ;;  %v172_v32 = vld [vmem:[#allocation2 + $0x2c0] sm:$0xff] }
  0x25   :  { %226 = vmatpush.msra.mxu0 %v85_v59  ;;  %246 = vmatpush.msra.mxu1 %v101_v60  ;;  %v206_v26 = vld [vmem:[#allocation2 + $0x3d0] sm:$0xff]  ;;  %v189_v29 = vld [vmem:[#allocation2 + $0x348] sm:$0xff]  ;;  %v188_v33 = vld [vmem:[#allocation2 + $0x340] sm:$0xff] }
  0x26   :  { %266 = vmatpush.msra.mxu2 %v117_v61  ;;  %286 = vmatpush.msra.mxu3 %v133_v62  ;;  %v205_v30 = vld [vmem:[#allocation2 + $0x3c8] sm:$0xff]  ;;  %v204_v34 = vld [vmem:[#allocation2 + $0x3c0] sm:$0xff]  ;;  %v155_v35 = vld [vmem:[#allocation2 + $0x238] sm:$0xff] }
  0x27   :  { %227 = vmatpush.msra.mxu0 %v84_v63  ;;  %247 = vmatpush.msra.mxu1 %v100_v0  ;;  %v171_v36 = vld [vmem:[#allocation2 + $0x2b8] sm:$0xff]  ;;  %v154_v39 = vld [vmem:[#allocation2 + $0x230] sm:$0xff]  ;;  %v153_v43 = vld [vmem:[#allocation2 + $0x228] sm:$0xff] }
  0x28   :  { %267 = vmatpush.msra.mxu2 %v116_v1  ;;  %287 = vmatpush.msra.mxu3 %v132_v2  ;;  %v187_v37 = vld [vmem:[#allocation2 + $0x338] sm:$0xff]  ;;  %v170_v40 = vld [vmem:[#allocation2 + $0x2b0] sm:$0xff]  ;;  %v169_v44 = vld [vmem:[#allocation2 + $0x2a8] sm:$0xff] }
  0x29   :  { %292 = vmatpush.msrb.mxu0 %v163_v3  ;;  %312 = vmatpush.msrb.mxu1 %v179_v4  ;;  %v203_v38 = vld [vmem:[#allocation2 + $0x3b8] sm:$0xff]  ;;  %v186_v41 = vld [vmem:[#allocation2 + $0x330] sm:$0xff]  ;;  %v185_v45 = vld [vmem:[#allocation2 + $0x328] sm:$0xff]  ;;  %v29_v3 = vlaneseq }
  0x2a   :  { %332 = vmatpush.msrb.mxu2 %v195_v5  ;;  %352 = vmatpush.msrb.mxu3 %v211_v6  ;;  %v202_v42 = vld [vmem:[#allocation2 + $0x3b0] sm:$0xff]  ;;  %v201_v46 = vld [vmem:[#allocation2 + $0x3a8] sm:$0xff]  ;;  %v152_v47 = vld [vmem:[#allocation2 + $0x220] sm:$0xff] }
  0x2b   :  { %293 = vmatpush.msrb.mxu0 %v162_v7  ;;  %313 = vmatpush.msrb.mxu1 %v178_v8  ;;  %v168_v48 = vld [vmem:[#allocation2 + $0x2a0] sm:$0xff]  ;;  %v151_v51 = vld [vmem:[#allocation2 + $0x218] sm:$0xff]  ;;  %v150_v55 = vld [vmem:[#allocation2 + $0x210] sm:$0xff]  ;;  %v30_v5 = vand.u32 127, %v29_v3 }
  0x2c   :  { %333 = vmatpush.msrb.mxu2 %v194_v9  ;;  %353 = vmatpush.msrb.mxu3 %v210_v10  ;;  %v184_v49 = vld [vmem:[#allocation2 + $0x320] sm:$0xff]  ;;  %v167_v52 = vld [vmem:[#allocation2 + $0x298] sm:$0xff]  ;;  %v166_v56 = vld [vmem:[#allocation2 + $0x290] sm:$0xff]  ;;  %v472_v10 = vmov 1.0  }
  0x2d   :  { %294 = vmatpush.msrb.mxu0 %v161_v11  ;;  %314 = vmatpush.msrb.mxu1 %v177_v12  ;;  %v200_v50 = vld [vmem:[#allocation2 + $0x3a0] sm:$0xff]  ;;  %v183_v53 = vld [vmem:[#allocation2 + $0x318] sm:$0xff]  ;;  %v182_v57 = vld [vmem:[#allocation2 + $0x310] sm:$0xff]  ;;  %v31_v6 = vadd.s32 128, %v30_v5  ;;  %v32_v7 = vadd.s32 256, %v30_v5  ;;  %v33_v9 = vadd.s32 384, %v30_v5 }
  0x2e   :  { %334 = vmatpush.msrb.mxu2 %v193_v13  ;;  %354 = vmatpush.msrb.mxu3 %v209_v14  ;;  %v199_v54 = vld [vmem:[#allocation2 + $0x398] sm:$0xff]  ;;  %v198_v58 = vld [vmem:[#allocation2 + $0x390] sm:$0xff]  ;;  %v149_v59 = vld [vmem:[#allocation2 + $0x208] sm:$0xff]  ;;  %v34_v11 = vadd.s32 512, %v30_v5  ;;  %v35_v12 = vadd.s32 640, %v30_v5  ;;  %v36_v13 = vadd.s32 768, %v30_v5 }
  0x2f   :  { %295 = vmatpush.msrb.mxu0 %v160_v15  ;;  %315 = vmatpush.msrb.mxu1 %v176_v16  ;;  %v165_v60 = vld [vmem:[#allocation2 + $0x288] sm:$0xff]  ;;  %v148_v63 = vld [vmem:[#allocation2 + $0x200] sm:$0xff]  ;;  %v37_v14 = vadd.s32 896, %v30_v5 }
  0x30   :  { %335 = vmatpush.msrb.mxu2 %v192_v17  ;;  %355 = vmatpush.msrb.mxu3 %v208_v18  ;;  %v181_v61 = vld [vmem:[#allocation2 + $0x308] sm:$0xff]  ;;  %v164_v0 = vld [vmem:[#allocation2 + $0x280] sm:$0xff] }
  0x31   :  { %296 = vmatpush.msrb.mxu0 %v159_v19  ;;  %316 = vmatpush.msrb.mxu1 %v175_v20  ;;  %v197_v62 = vld [vmem:[#allocation2 + $0x388] sm:$0xff]  ;;  %v180_v1 = vld [vmem:[#allocation2 + $0x300] sm:$0xff] }
  0x32   :  { %336 = vmatpush.msrb.mxu2 %v191_v21  ;;  %356 = vmatpush.msrb.mxu3 %v207_v22  ;;  %v196_v2 = vld [vmem:[#allocation2 + $0x380] sm:$0xff] }
  0x33   :  { %297 = vmatpush.msrb.mxu0 %v158_v23  ;;  %317 = vmatpush.msrb.mxu1 %v174_v24 }
  0x34   :  { %337 = vmatpush.msrb.mxu2 %v190_v25  ;;  %357 = vmatpush.msrb.mxu3 %v206_v26 }
  0x35   :  { %298 = vmatpush.msrb.mxu0 %v157_v27  ;;  %318 = vmatpush.msrb.mxu1 %v173_v28 }
  0x36   :  { %338 = vmatpush.msrb.mxu2 %v189_v29  ;;  %358 = vmatpush.msrb.mxu3 %v205_v30 }
  0x37   :  { %299 = vmatpush.msrb.mxu0 %v156_v31  ;;  %319 = vmatpush.msrb.mxu1 %v172_v32 }
  0x38   :  { %339 = vmatpush.msrb.mxu2 %v188_v33  ;;  %359 = vmatpush.msrb.mxu3 %v204_v34 }
  0x39   :  { %300 = vmatpush.msrb.mxu0 %v155_v35  ;;  %320 = vmatpush.msrb.mxu1 %v171_v36 }
  0x3a   :  { %340 = vmatpush.msrb.mxu2 %v187_v37  ;;  %360 = vmatpush.msrb.mxu3 %v203_v38 }
  0x3b   :  { %301 = vmatpush.msrb.mxu0 %v154_v39  ;;  %321 = vmatpush.msrb.mxu1 %v170_v40 }
  0x3c   :  { %341 = vmatpush.msrb.mxu2 %v186_v41  ;;  %361 = vmatpush.msrb.mxu3 %v202_v42 }
  0x3d   :  { %302 = vmatpush.msrb.mxu0 %v153_v43  ;;  %322 = vmatpush.msrb.mxu1 %v169_v44 }
  0x3e   :  { %342 = vmatpush.msrb.mxu2 %v185_v45  ;;  %362 = vmatpush.msrb.mxu3 %v201_v46 }
  0x3f   :  { %303 = vmatpush.msrb.mxu0 %v152_v47  ;;  %323 = vmatpush.msrb.mxu1 %v168_v48 }
  0x40   :  { %343 = vmatpush.msrb.mxu2 %v184_v49  ;;  %363 = vmatpush.msrb.mxu3 %v200_v50 }
  0x41   :  { %304 = vmatpush.msrb.mxu0 %v151_v51  ;;  %324 = vmatpush.msrb.mxu1 %v167_v52 }
  0x42   :  { %344 = vmatpush.msrb.mxu2 %v183_v53  ;;  %364 = vmatpush.msrb.mxu3 %v199_v54 }
  0x43   :  { %305 = vmatpush.msrb.mxu0 %v150_v55  ;;  %325 = vmatpush.msrb.mxu1 %v166_v56 }
  0x44   :  { %345 = vmatpush.msrb.mxu2 %v182_v57  ;;  %365 = vmatpush.msrb.mxu3 %v198_v58 }
  0x45   :  { %306 = vmatpush.msrb.mxu0 %v149_v59  ;;  %326 = vmatpush.msrb.mxu1 %v165_v60 }
  0x46   :  { %346 = vmatpush.msrb.mxu2 %v181_v61  ;;  %366 = vmatpush.msrb.mxu3 %v197_v62 }
  0x47   :  { %307 = vmatpush.msrb.mxu0 %v148_v63  ;;  %327 = vmatpush.msrb.mxu1 %v164_v0 }
  0x48   :  { %347 = vmatpush.msrb.mxu2 %v180_v1  ;;  %367 = vmatpush.msrb.mxu3 %v196_v2 }
  0x7a   :  { %v40_v4 = vpop.permute.xlu0 %39 }
  0x7b   :  { %vm41_vm0 = vcmp.eq.s32.totalorder %v30_v5, %v40_v4  ;;  %vm42_vm5 = vcmp.eq.s32.totalorder %v31_v6, %v40_v4  ;;  %vm43_vm8 = vcmp.eq.s32.totalorder %v32_v7, %v40_v4  ;;  %vm44_vm10 = vcmp.eq.s32.totalorder %v33_v9, %v40_v4 }
  0x7c   :  { %vm45_vm14 = vcmp.eq.s32.totalorder %v34_v11, %v40_v4 }
  0x83   :  { %v51_v8 = vpop.permute.xlu0 %50 }
  0x84   :  { %vm52_vm1 = vcmp.eq.s32.totalorder %v30_v5, %v51_v8  ;;  %vm53_vm2 = vcmp.eq.s32.totalorder %v31_v6, %v51_v8  ;;  %vm54_vm3 = vcmp.eq.s32.totalorder %v32_v7, %v51_v8  ;;  %vm55_vm6 = vcmp.eq.s32.totalorder %v33_v9, %v51_v8 }
  0x85   :  { %vm60_vm4 = vmor %vm41_vm0, %vm52_vm1  ;;  %vm56_vm12 = vcmp.eq.s32.totalorder %v34_v11, %v51_v8  ;;  %vm57_vm13 = vcmp.eq.s32.totalorder %v35_v12, %v51_v8  ;;  %vm58_vm15 = vcmp.eq.s32.totalorder %v36_v13, %v51_v8  ;;  %vm46_vm1 = vcmp.eq.s32.totalorder %v35_v12, %v40_v4 }
  0x86   :  { %398 = vmatmul.msk.f32.vlgmr.msra.gmra.mxu0 %vm60_vm4, %v472_v10  ;;  %vm61_vm7 = vmor %vm42_vm5, %vm53_vm2  ;;  %vm59_vm4 = vcmp.eq.s32.totalorder %v37_v14, %v51_v8  ;;  %vm47_vm5 = vcmp.eq.s32.totalorder %v36_v13, %v40_v4 }
  0x87   :  { %399 = vmatmul.msk.f32.vlgmr.msra.gmra.mxu1 %vm61_vm7, %v472_v10  ;;  %vm62_vm9 = vmor %vm43_vm8, %vm54_vm3  ;;  %vm48_vm7 = vcmp.eq.s32.totalorder %v37_v14, %v40_v4 }
  0x88   :  { %400 = vmatmul.msk.f32.vlgmr.msra.gmra.mxu2 %vm62_vm9, %v472_v10  ;;  %vm63_vm11 = vmor %vm44_vm10, %vm55_vm6 }
  0x89   :  { %401 = vmatmul.msk.f32.vlgmr.msra.gmra.mxu3 %vm63_vm11, %v472_v10  ;;  %vm64_vm0 = vmor %vm45_vm14, %vm56_vm12 }
  0x8a   :  { %vm65_vm2 = vmor %vm46_vm1, %vm57_vm13 }
  0x8b   :  { %vm66_vm3 = vmor %vm47_vm5, %vm58_vm15 }
  0x8c   :  { %vm67_vm6 = vmor %vm48_vm7, %vm59_vm4 }
  0x8e   :  { %402 = vmatmul.msk.f32.vlgmr.msrb.gmra.mxu0 %vm64_vm0, %v472_v10 }
  0x8f   :  { %403 = vmatmul.msk.f32.vlgmr.msrb.gmra.mxu1 %vm65_vm2, %v472_v10 }
  0x90   :  { %404 = vmatmul.msk.f32.vlgmr.msrb.gmra.mxu2 %vm66_vm3, %v472_v10 }
  0x91   :  { %405 = vmatmul.msk.f32.vlgmr.msrb.gmra.mxu3 %vm67_vm6, %v472_v10 }
 0x103   :  { %v229_v15 = vpop.f32.mrf.mxu0 }
 0x104   :  { %v249_v16 = vpop.f32.mrf.mxu1 }
 0x105   :  { %v250_v17 = vadd.f32 %v249_v16, %v229_v15 }
 0x10b   :  { %v269_v18 = vpop.f32.mrf.mxu2  ;;  %v309_v22 = vpop.f32.mrf.mxu0 }
 0x10c   :  { %v270_v19 = vadd.f32 %v269_v18, %v250_v17  ;;  %v289_v20 = vpop.f32.mrf.mxu3  ;;  %v329_v24 = vpop.f32.mrf.mxu1 }
 0x10e   :  { %v290_v21 = vadd.f32 %v289_v20, %v270_v19 }
 0x110   :  { %v310_v23 = vadd.f32 %v309_v22, %v290_v21 }
 0x112   :  { %v330_v25 = vadd.f32 %v329_v24, %v310_v23 }
 0x113   :  { %v349_v26 = vpop.f32.mrf.mxu2 }
 0x114   :  { %v350_v27 = vadd.f32 %v349_v26, %v330_v25  ;;  %v369_v28 = vpop.f32.mrf.mxu3 }
 0x116   :  { %v370_v29 = vadd.f32 %v369_v28, %v350_v27 }
 0x118   :  { %372 = vst [vmem:[#allocation5] sm:$0xff] %v370_v29 }
 0x119   :  { %383 = dma.vmem_to_hbm [thread:$0]  %s379_s1, 128, %s381_s20, [#allocation4]  }
 0x11a   :  { %465 = dma.done.wait [#allocation4], 128  }
 0x11b   :  { %466 = vsyncadd [#allocation4], 4294967168 }
 0x11c   :  { %388 = vsyncpa [#allocation3], 1 }
 0x11d   :  { %389 = vsyncpa [#allocation4], 1 }

</bundles_post_ra>
